<compile_context>
chip_gen: v7x
topology: tpu7x:2x2x1
jax: 0.10.0
libtpu: 0.0.40
codegen_flags: <defaults>
</compile_context>

<pallas_src>
import functools

import numpy as np
import jax
import jax.numpy as jnp
from jax.experimental import pallas as pl
from jax.experimental.pallas import tpu as pltpu


def _round_up(x, m):
    return (x + m - 1) // m * m


# ----------------------------------------------------------------------------
# Pallas kernel: one-hot gather via MXU, vocab-tiled reduction
# ----------------------------------------------------------------------------
def _embed_kernel(ids_ref, w_ref, o_ref, acc_ref, *, tile_v):
    vj = pl.program_id(1)

    @pl.when(vj == 0)
    def _init():
        acc_ref[...] = jnp.zeros_like(acc_ref)

    ids = ids_ref[...]                      # (tile_r, 1) int32
    tile_r = ids.shape[0]
    # vocab ids covered by this vocab tile
    vocab_ids = jax.lax.broadcasted_iota(jnp.int32, (tile_r, tile_v), 1) + vj * tile_v
    onehot = (vocab_ids == ids).astype(w_ref.dtype)          # (tile_r, tile_v)
    acc_ref[...] += jnp.dot(onehot, w_ref[...],
                            preferred_element_type=jnp.float32)

    @pl.when(vj == pl.num_programs(1) - 1)
    def _finalize():
        o_ref[...] = acc_ref[...].astype(o_ref.dtype)


# ----------------------------------------------------------------------------
# Wrapper: nn.Embedding.forward
# ----------------------------------------------------------------------------
def embedder_forward(x, weight, *, max_tile_r=512, max_tile_v=512):
    """Embedder forward: weight[x].  x: integer ids of any shape, weight: (V, D)."""
    V, D = weight.shape
    orig_shape = x.shape
    ids = x.reshape(-1).astype(jnp.int32)
    N = ids.shape[0]

    tile_r = min(max_tile_r, _round_up(N, 8))
    n_pad = _round_up(N, tile_r)
    tile_v = min(max_tile_v, _round_up(V, 8))
    v_pad = _round_up(V, tile_v)

    # Padded rows gather row 0 and are sliced off afterwards; padded vocab rows
    # are zero and are never selected by a valid id.
    ids_2d = jnp.pad(ids, (0, n_pad - N)).reshape(n_pad, 1)
    w_pad = jnp.pad(weight, ((0, v_pad - V), (0, 0)))

    grid = (n_pad // tile_r, v_pad // tile_v)

    kernel = functools.partial(_embed_kernel, tile_v=tile_v)
    out_pad = pl.pallas_call(
        kernel,
        out_shape=jax.ShapeDtypeStruct((n_pad, D), weight.dtype),
        grid=grid,
        in_specs=[
            pl.BlockSpec((tile_r, 1), lambda i, j: (i, 0)),   # ids tile (resident per row-tile)
            pl.BlockSpec((tile_v, D), lambda i, j: (j, 0)),   # vocab tile of the table
        ],
        out_specs=pl.BlockSpec((tile_r, D), lambda i, j: (i, 0)),
        scratch_shapes=[pltpu.VMEM((tile_r, D), jnp.float32)],
        compiler_params=pltpu.CompilerParams(
            dimension_semantics=("parallel", "arbitrary")),
        cost_estimate=pl.CostEstimate(
            flops=2 * n_pad * v_pad * D,
            transcendentals=0,
            bytes_accessed=n_pad * 4 + v_pad * D * 4 + n_pad * D * 4),
    )(ids_2d, w_pad)

    return out_pad[:N].reshape(*orig_shape, D)


# ----------------------------------------------------------------------------
# Demo / correctness check
# ----------------------------------------------------------------------------
if __name__ == "__main__":
    VOCAB, D_MODEL = 1000, 32        # vocab_size, d_model
    B, S = 2, 8                      # batch, seq_len

    key = jax.random.PRNGKey(0)
    k_ids, k_w = jax.random.split(key)
    x = jax.random.randint(k_ids, (B, S), 0, VOCAB, dtype=jnp.int32)
    weight = jax.random.normal(k_w, (VOCAB, D_MODEL), dtype=jnp.float32)

    out = embedder_forward(x, weight)
    out = jax.block_until_ready(out)

    ref = weight[x]                  # (B, S, D) — nn.Embedding reference
    np.testing.assert_allclose(np.asarray(out), np.asarray(ref),
                               rtol=0.0, atol=1e-6)
    assert out.shape == (B, S, D_MODEL)

    print("KERNEL_OK")
</pallas_src>

<mosaic_0001>
module attributes {stable_mosaic.version = 11 : i64} {
  func.func @_embed_kernel(%arg0: i32, %arg1: i32, %arg2: memref<16x1xi32, #tpu.memory_space<vmem>>, %arg3: memref<512x32xf32, #tpu.memory_space<vmem>>, %arg4: memref<16x32xf32, #tpu.memory_space<vmem>>, %arg5: memref<16x32xf32, #tpu.memory_space<vmem>>) attributes {dimension_semantics = [#tpu.dimension_semantics<parallel>, #tpu.dimension_semantics<arbitrary>], iteration_bounds = array<i64: 1, 2>, scalar_prefetch = 0 : i64, scratch_operands = 1 : i64, tpu.core_type = #tpu.core_type<tc>, window_params = [{transform_indices = @transform_0, window_bounds = array<i64: 16, 1>}, {transform_indices = @transform_1, window_bounds = array<i64: 512, 32>}, {transform_indices = @transform_2, window_bounds = array<i64: 16, 32>}]} {
    %c0_i32 = arith.constant 0 : i32
    %0 = arith.cmpi eq, %arg1, %c0_i32 : i32
    %1 = arith.extui %0 : i1 to i32
    %c0_i32_0 = arith.constant 0 : i32
    %2 = arith.cmpi ne, %1, %c0_i32_0 : i32
    scf.if %2 {
      %cst_9 = arith.constant 0.000000e+00 : f32
      %20 = vector.broadcast %cst_9 : f32 to vector<16x32xf32>
      %c0_10 = arith.constant 0 : index
      %c0_11 = arith.constant 0 : index
      %21 = vector.load %arg5[%c0_10, %c0_11] : memref<16x32xf32, #tpu.memory_space<vmem>>, vector<16x32xf32>
      tpu.vector_store %arg5[%c0_10, %c0_11], %20 {strides = array<i32>} : memref<16x32xf32, #tpu.memory_space<vmem>>, vector<16x32xf32>,
    } else {
    }
    %c0 = arith.constant 0 : index
    %c0_1 = arith.constant 0 : index
    %3 = vector.load %arg2[%c0, %c0_1] : memref<16x1xi32, #tpu.memory_space<vmem>>, vector<16x1xi32>
    %4 = tpu.iota {dimensions = array<i32: 1>} : vector<16x512xi32>
    %c512_i32 = arith.constant 512 : i32
    %5 = arith.muli %arg1, %c512_i32 : i32
    %6 = vector.broadcast %5 : i32 to vector<16x512xi32>
    %7 = arith.addi %4, %6 : vector<16x512xi32>
    %8 = vector.broadcast %3 : vector<16x1xi32> to vector<16x512xi32>
    %9 = arith.cmpi eq, %7, %8 : vector<16x512xi32>
    %10 = arith.extui %9 : vector<16x512xi1> to vector<16x512xi32>
    %11 = arith.sitofp %10 : vector<16x512xi32> to vector<16x512xf32>
    %c0_2 = arith.constant 0 : index
    %c0_3 = arith.constant 0 : index
    %12 = vector.load %arg5[%c0_2, %c0_3] : memref<16x32xf32, #tpu.memory_space<vmem>>, vector<16x32xf32>
    %c0_4 = arith.constant 0 : index
    %c0_5 = arith.constant 0 : index
    %13 = vector.load %arg3[%c0_4, %c0_5] : memref<512x32xf32, #tpu.memory_space<vmem>>, vector<512x32xf32>
    %cst = arith.constant dense<0.000000e+00> : vector<16x32xf32>
    %14 = tpu.matmul %11, %13, %cst {dimension_numbers = #tpu.dot_dimension_numbers<[1], [0], [0], [1], [0, 0, 1, 1], [], []>} : vector<16x512xf32>, vector<512x32xf32>, vector<16x32xf32> -> vector<16x32xf32>
    %15 = arith.addf %12, %14 : vector<16x32xf32>
    %c0_6 = arith.constant 0 : index
    %c0_7 = arith.constant 0 : index
    %16 = vector.load %arg5[%c0_6, %c0_7] : memref<16x32xf32, #tpu.memory_space<vmem>>, vector<16x32xf32>
    tpu.vector_store %arg5[%c0_6, %c0_7], %15 {strides = array<i32>} : memref<16x32xf32, #tpu.memory_space<vmem>>, vector<16x32xf32>,
    %c1_i32 = arith.constant 1 : i32
    %17 = arith.cmpi eq, %arg1, %c1_i32 : i32
    %18 = arith.extui %17 : i1 to i32
    %c0_i32_8 = arith.constant 0 : i32
    %19 = arith.cmpi ne, %18, %c0_i32_8 : i32
    scf.if %19 {
      %c0_9 = arith.constant 0 : index
      %c0_10 = arith.constant 0 : index
      %20 = vector.load %arg5[%c0_9, %c0_10] : memref<16x32xf32, #tpu.memory_space<vmem>>, vector<16x32xf32>
      %c0_11 = arith.constant 0 : index
      %c0_12 = arith.constant 0 : index
      %21 = vector.load %arg4[%c0_11, %c0_12] : memref<16x32xf32, #tpu.memory_space<vmem>>, vector<16x32xf32>
      tpu.vector_store %arg4[%c0_11, %c0_12], %20 {strides = array<i32>} : memref<16x32xf32, #tpu.memory_space<vmem>>, vector<16x32xf32>,
    } else {
    }
    return
  }
  func.func @transform_0(%arg0: i32, %arg1: i32) -> (i32, i32) {
    %c0_i32 = arith.constant 0 : i32
    %c0_i32_0 = arith.constant 0 : i32
    return %arg0, %c0_i32 : i32, i32
  }
  func.func @transform_1(%arg0: i32, %arg1: i32) -> (i32, i32) {
    %c0_i32 = arith.constant 0 : i32
    %c0_i32_0 = arith.constant 0 : i32
    return %arg1, %c0_i32 : i32, i32
  }
  func.func @transform_2(%arg0: i32, %arg1: i32) -> (i32, i32) {
    %c0_i32 = arith.constant 0 : i32
    %c0_i32_0 = arith.constant 0 : i32
    return %arg0, %c0_i32 : i32, i32
  }
}

</mosaic_0001>

<bundles_post_ra>
// kernel: tpu_custom_call.1
= control target key start
LH: loop header
LB: loop body
LE: loop exit
PB: predicated region body
PF: predicated region fallthrough
CT: control target
= control target key end

     0   :  { %7 = vsyncpa [#allocation4], 0  ;;  %s810_s9 = smov 0   ;;  %s812_s10 = smov 0   ;;  %s951_s0 = inlined_call_operand.vmem [shape: s32[16,1], index: 0, kind: input, shape index: {}]   ;;  %s952_s1 = inlined_call_operand.vmem [shape: f32[1024,32], index: 1, kind: input, shape index: {}]   ;;  %s953_s2 = inlined_call_operand.hbm [shape: f32[16,32], index: 2, kind: output, shape index: {}]  }
   0x1   :  { %s814_s11 = smov 0  }
   0x2 LB: > { %s528_s12 = sadd.s32 4294967295, %s787_s11   ;;  %s22_s13 = sadd.s32 1, %s783_s10  ;;  %s787_s11 = sphi %s814_s11, %s13_s11   ;;  %s783_s10 = sphi %s812_s10, %s956_s10   ;;  %s779_s9 = sphi %s810_s9, %s955_s9  }
   0x3   : > { %p23_p0 = scmp.ge.s32.totalorder %s22_s13, 2  ;;  %p532_p1 = scmp.ge.s32.totalorder %s787_s11, 1 }
   0x4   : > { %p137_p2 = scmp.lt.s32.totalorder %s787_s11, 3 }
   0x5   : > { %s958_s13 = smov (%p23_p0, %s22_s13), 0 }
   0x6   : > { %p138_p3 = pnand %p532_p1, %p137_p2 }
   0x7   : > { %s533_s14 = sshll.u32 (!%p138_p3), %s779_s9, 6  ;;  %p535_p5 = scmp.ne.s32.totalorder (!%p138_p3), %s779_s9, 0 }
   0x8   : > { %141 = sbr.rel (%p138_p3) target bundleno = 412 (0x19c), region = 28  ;;  %p166_p4 = scmp.lt.s32.totalorder (!%p138_p3), %s533_s14, 127 }
   0xf   : > { %s960_s14 = smov (!%p166_p4, %s533_s14), 127  ;;  %175 = sbr.rel (%p535_p5) target bundleno = 22 (0x16), region = 32 }
  0x10   : > { %s534_s15 = sshll.u32 %s960_s14, 3  ;;  %vm176_vm0 = vcmask (!%p535_p5), 261120   ;;  %v789_v0 = vmov (!%p535_p5), 0.0  }
  0x11   : > { %s835_s18 = scalar_lea.vmem %s952_s1, %s534_s15  ;;  %177 = vst.msk [vmem:[#allocation2] sm:$0xff] (!%p535_p5), %vm176_vm0, %v789_v0  ;;  %178 = vst.msk [vmem:[#allocation2 + $0x8] sm:$0xff] (!%p535_p5), %vm176_vm0, %v789_v0 }
  0x16 PF: > { %v179_v1 = vld [vmem:[%s951_s0] sm:$0xff]  ;;  %v790_v3 = vmov 0   ;;  %v180_v4 = vld [vmem:[%s951_s0 + $0x8] sm:$0xff]  ;;  %v242_v15 = vld [vmem:[%s835_s18 + $0x90] sm:$0xff]  ;;  %s536_s23 = sshll.u32 %s779_s9, 9  ;;  %vm440_vm9 = vcmask 261120  }
  0x17   : > { %v240_v2 = vld [vmem:[%s835_s18 + $0x80] sm:$0xff]  ;;  %734 = vset.pattern.permute.xlu0 %v790_v3  ;;  %v241_v5 = vld [vmem:[%s835_s18 + $0x88] sm:$0xff]  ;;  %v243_v16 = vld [vmem:[%s835_s18 + $0x98] sm:$0xff]  ;;  %p553_p6 = scmp.ne.s32.totalorder %s779_s9, 1 }
  0x18   : > { %v272_v6 = vld [vmem:[%s835_s18 + $0x180] sm:$0xff]  ;;  %v273_v7 = vld [vmem:[%s835_s18 + $0x188] sm:$0xff]  ;;  %193 = vperm.xlu0 %734, %v179_v1   ;;  %v634_v8 = vpack.c.bf16 %v241_v5, %v240_v2  ;;  %v638_v18 = vpack.c.bf16 %v243_v16, %v242_v15  ;;  %v274_v19 = vld [vmem:[%s835_s18 + $0x190] sm:$0xff] }
  0x19   : > { %v666_v9 = vpack.c.bf16 %v273_v7, %v272_v6  ;;  %v224_v10 = vld [vmem:[%s835_s18] sm:$0xff]  ;;  %v225_v11 = vld [vmem:[%s835_s18 + $0x8] sm:$0xff]  ;;  %v275_v20 = vld [vmem:[%s835_s18 + $0x198] sm:$0xff] }
  0x1a   : > { %v256_v12 = vld [vmem:[%s835_s18 + $0x100] sm:$0xff]  ;;  %v636_v13 = vpack.c.bf16 %v225_v11, %v224_v10  ;;  %v257_v14 = vld [vmem:[%s835_s18 + $0x108] sm:$0xff]  ;;  %635 = vmatprep.subr.bf16.mxu0 %v634_v8  ;;  %v226_v21 = vld [vmem:[%s835_s18 + $0x10] sm:$0xff]  ;;  %v670_v22 = vpack.c.bf16 %v275_v20, %v274_v19 }
  0x1b   : > { %667 = vmatprep.subr.bf16.mxu1 %v666_v9  ;;  %v668_v17 = vpack.c.bf16 %v257_v14, %v256_v12  ;;  %v227_v23 = vld [vmem:[%s835_s18 + $0x18] sm:$0xff]  ;;  %v258_v24 = vld [vmem:[%s835_s18 + $0x110] sm:$0xff]  ;;  %v244_v28 = vld [vmem:[%s835_s18 + $0xa0] sm:$0xff] }
  0x1c   : > { %637 = vmatpush3.bf16.msra.mxu0 %v636_v13  ;;  %v259_v25 = vld [vmem:[%s835_s18 + $0x118] sm:$0xff]  ;;  %196 = vperm.xlu0 %734, %v180_v4   ;;  %v640_v26 = vpack.c.bf16 %v227_v23, %v226_v21  ;;  %v245_v29 = vld [vmem:[%s835_s18 + $0xa8] sm:$0xff]  ;;  %v276_v30 = vld [vmem:[%s835_s18 + $0x1a0] sm:$0xff] }
  0x1d   : > { %669 = vmatpush3.bf16.msra.mxu1 %v668_v17  ;;  %v672_v27 = vpack.c.bf16 %v259_v25, %v258_v24  ;;  %639 = vmatprep.subr.bf16.mxu0 %v638_v18  ;;  %v642_v31 = vpack.c.bf16 %v245_v29, %v244_v28  ;;  %v277_v32 = vld [vmem:[%s835_s18 + $0x1a8] sm:$0xff]  ;;  %v228_v33 = vld [vmem:[%s835_s18 + $0x20] sm:$0xff]  ;;  %v246_v38 = vld [vmem:[%s835_s18 + $0xb0] sm:$0xff] }
  0x1e   : > { %671 = vmatprep.subr.bf16.mxu1 %v670_v22  ;;  %v229_v34 = vld [vmem:[%s835_s18 + $0x28] sm:$0xff]  ;;  %v674_v35 = vpack.c.bf16 %v277_v32, %v276_v30  ;;  %v260_v36 = vld [vmem:[%s835_s18 + $0x120] sm:$0xff]  ;;  %v247_v40 = vld [vmem:[%s835_s18 + $0xb8] sm:$0xff] }
  0x1f   : > { %v261_v37 = vld [vmem:[%s835_s18 + $0x128] sm:$0xff]  ;;  %v644_v39 = vpack.c.bf16 %v229_v34, %v228_v33  ;;  %v278_v41 = vld [vmem:[%s835_s18 + $0x1b0] sm:$0xff]  ;;  %v279_v42 = vld [vmem:[%s835_s18 + $0x1b8] sm:$0xff]  ;;  %v646_v44 = vpack.c.bf16 %v247_v40, %v246_v38 }
  0x20   : > { %641 = vmatpush3.bf16.msra.mxu0 %v640_v26  ;;  %v676_v43 = vpack.c.bf16 %v261_v37, %v260_v36  ;;  %v230_v45 = vld [vmem:[%s835_s18 + $0x30] sm:$0xff]  ;;  %v231_v46 = vld [vmem:[%s835_s18 + $0x38] sm:$0xff]  ;;  %v678_v48 = vpack.c.bf16 %v279_v42, %v278_v41  ;;  %v248_v50 = vld [vmem:[%s835_s18 + $0xc0] sm:$0xff]  ;;  %v181_v36 = vlaneseq  ;;  %v187_v41 = vstv %s536_s23 }
  0x21   : > { %673 = vmatpush3.bf16.msra.mxu1 %v672_v27  ;;  %643 = vmatprep.subr.bf16.mxu0 %v642_v31  ;;  %v262_v47 = vld [vmem:[%s835_s18 + $0x130] sm:$0xff]  ;;  %v263_v49 = vld [vmem:[%s835_s18 + $0x138] sm:$0xff]  ;;  %v249_v51 = vld [vmem:[%s835_s18 + $0xc8] sm:$0xff]  ;;  %v648_v54 = vpack.c.bf16 %v231_v46, %v230_v45 }
  0x22   : > { %675 = vmatprep.subr.bf16.mxu1 %v674_v35  ;;  %v280_v52 = vld [vmem:[%s835_s18 + $0x1c0] sm:$0xff]  ;;  %v281_v53 = vld [vmem:[%s835_s18 + $0x1c8] sm:$0xff]  ;;  %v680_v55 = vpack.c.bf16 %v263_v49, %v262_v47  ;;  %v650_v56 = vpack.c.bf16 %v249_v51, %v248_v50  ;;  %v250_v62 = vld [vmem:[%s835_s18 + $0xd0] sm:$0xff]  ;;  %v182_v37 = vand.u32 127, %v181_v36  ;;  %v791_v47 = vmov 1.0  }
  0x23   : > { %v232_v57 = vld [vmem:[%s835_s18 + $0x40] sm:$0xff]  ;;  %v233_v58 = vld [vmem:[%s835_s18 + $0x48] sm:$0xff]  ;;  %v682_v60 = vpack.c.bf16 %v281_v53, %v280_v52  ;;  %v251_v63 = vld [vmem:[%s835_s18 + $0xd8] sm:$0xff] }
  0x24   : > { %645 = vmatpush3.bf16.msra.mxu0 %v644_v39  ;;  %v264_v59 = vld [vmem:[%s835_s18 + $0x140] sm:$0xff]  ;;  %v265_v61 = vld [vmem:[%s835_s18 + $0x148] sm:$0xff]  ;;  %v282_v0 = vld [vmem:[%s835_s18 + $0x1d0] sm:$0xff]  ;;  %v652_v2 = vpack.c.bf16 %v233_v58, %v232_v57  ;;  %v654_v4 = vpack.c.bf16 %v251_v63, %v250_v62  ;;  %v183_v38 = vadd.s32 128, %v182_v37  ;;  %v185_v39 = vadd.s32 384, %v182_v37 }
  0x25   : > { %677 = vmatpush3.bf16.msra.mxu1 %v676_v43  ;;  %647 = vmatprep.subr.bf16.mxu0 %v646_v44  ;;  %v283_v1 = vld [vmem:[%s835_s18 + $0x1d8] sm:$0xff]  ;;  %v684_v3 = vpack.c.bf16 %v265_v61, %v264_v59  ;;  %v234_v5 = vld [vmem:[%s835_s18 + $0x50] sm:$0xff]  ;;  %v252_v10 = vld [vmem:[%s835_s18 + $0xe0] sm:$0xff]  ;;  %v184_v40 = vadd.s32 256, %v182_v37  ;;  %v188_v44 = vadd.s32 %v187_v41, %v182_v37 }
  0x26   : > { %679 = vmatprep.subr.bf16.mxu1 %v678_v48  ;;  %v235_v6 = vld [vmem:[%s835_s18 + $0x58] sm:$0xff]  ;;  %v266_v7 = vld [vmem:[%s835_s18 + $0x150] sm:$0xff]  ;;  %v686_v8 = vpack.c.bf16 %v283_v1, %v282_v0  ;;  %v253_v11 = vld [vmem:[%s835_s18 + $0xe8] sm:$0xff]  ;;  %v189_v42 = vadd.s32 %v187_v41, %v183_v38  ;;  %v191_v43 = vadd.s32 %v187_v41, %v185_v39 }
  0x27   : > { %v267_v9 = vld [vmem:[%s835_s18 + $0x158] sm:$0xff]  ;;  %v284_v12 = vld [vmem:[%s835_s18 + $0x1e0] sm:$0xff]  ;;  %v285_v13 = vld [vmem:[%s835_s18 + $0x1e8] sm:$0xff]  ;;  %v656_v14 = vpack.c.bf16 %v235_v6, %v234_v5  ;;  %v658_v16 = vpack.c.bf16 %v253_v11, %v252_v10  ;;  %v190_v45 = vadd.s32 %v187_v41, %v184_v40 }
  0x28   : > { %649 = vmatpush3.bf16.msra.mxu0 %v648_v54  ;;  %v688_v15 = vpack.c.bf16 %v267_v9, %v266_v7  ;;  %v236_v17 = vld [vmem:[%s835_s18 + $0x60] sm:$0xff]  ;;  %v237_v18 = vld [vmem:[%s835_s18 + $0x68] sm:$0xff]  ;;  %v690_v20 = vpack.c.bf16 %v285_v13, %v284_v12  ;;  %v254_v22 = vld [vmem:[%s835_s18 + $0xf0] sm:$0xff] }
  0x29   : > { %681 = vmatpush3.bf16.msra.mxu1 %v680_v55  ;;  %651 = vmatprep.subr.bf16.mxu0 %v650_v56  ;;  %v268_v19 = vld [vmem:[%s835_s18 + $0x160] sm:$0xff]  ;;  %v269_v21 = vld [vmem:[%s835_s18 + $0x168] sm:$0xff]  ;;  %v255_v23 = vld [vmem:[%s835_s18 + $0xf8] sm:$0xff]  ;;  %v660_v26 = vpack.c.bf16 %v237_v18, %v236_v17 }
  0x2a   : > { %683 = vmatprep.subr.bf16.mxu1 %v682_v60  ;;  %v286_v24 = vld [vmem:[%s835_s18 + $0x1f0] sm:$0xff]  ;;  %v287_v25 = vld [vmem:[%s835_s18 + $0x1f8] sm:$0xff]  ;;  %v692_v27 = vpack.c.bf16 %v269_v21, %v268_v19  ;;  %v662_v28 = vpack.c.bf16 %v255_v23, %v254_v22  ;;  %v222_v55 = vld [vmem:[#allocation2] sm:$0xff] }
  0x2b   : > { %v238_v29 = vld [vmem:[%s835_s18 + $0x70] sm:$0xff]  ;;  %v239_v30 = vld [vmem:[%s835_s18 + $0x78] sm:$0xff]  ;;  %v694_v31 = vpack.c.bf16 %v287_v25, %v286_v24  ;;  %v223_v0 = vld [vmem:[#allocation2 + $0x8] sm:$0xff] }
  0x2c   : > { %653 = vmatpush3.bf16.msra.mxu0 %v652_v2  ;;  %v270_v32 = vld [vmem:[%s835_s18 + $0x170] sm:$0xff]  ;;  %v271_v33 = vld [vmem:[%s835_s18 + $0x178] sm:$0xff]  ;;  %v664_v34 = vpack.c.bf16 %v239_v30, %v238_v29 }
  0x2d   : > { %685 = vmatpush3.bf16.msra.mxu1 %v684_v3  ;;  %655 = vmatprep.subr.bf16.mxu0 %v654_v4  ;;  %v696_v35 = vpack.c.bf16 %v271_v33, %v270_v32 }
  0x2e   : > { %687 = vmatprep.subr.bf16.mxu1 %v686_v8 }
  0x30   : > { %657 = vmatpush3.bf16.msra.mxu0 %v656_v14 }
  0x31   : > { %689 = vmatpush3.bf16.msra.mxu1 %v688_v15  ;;  %659 = vmatprep.subr.bf16.mxu0 %v658_v16 }
  0x32   : > { %691 = vmatprep.subr.bf16.mxu1 %v690_v20 }
  0x34   : > { %661 = vmatpush3.bf16.msra.mxu0 %v660_v26 }
  0x35   : > { %693 = vmatpush3.bf16.msra.mxu1 %v692_v27  ;;  %663 = vmatprep.subr.bf16.mxu0 %v662_v28 }
  0x36   : > { %695 = vmatprep.subr.bf16.mxu1 %v694_v31 }
  0x38   : > { %665 = vmatpush3.bf16.msra.mxu0 %v664_v34 }
  0x39   : > { %697 = vmatpush3.bf16.msra.mxu1 %v696_v35 }
  0x97   : > { %v194_v46 = vpop.permute.xlu0 %193 }
  0x98   : > { %vm199_vm1 = vcmp.eq.s32.totalorder %v189_v42, %v194_v46  ;;  %vm201_vm2 = vcmp.eq.s32.totalorder %v191_v43, %v194_v46  ;;  %vm198_vm3 = vcmp.eq.s32.totalorder %v188_v44, %v194_v46  ;;  %vm200_vm4 = vcmp.eq.s32.totalorder %v190_v45, %v194_v46 }
  0x99   : > { %545 = vmatprep.mubr.msk.f32.mxu0 %vm199_vm1, %v791_v47  ;;  %549 = vmatprep.mubr.msk.f32.mxu1 %vm201_vm2, %v791_v47 }
  0x9a   : > { %546 = vmatmul.mubr.msk.f32.vlgmr.msra.gmra.mrb[0].mxu0 %vm198_vm3, %v791_v47  ;;  %550 = vmatmul.mubr.msk.f32.vlgmr.msra.gmra.mrb[0].mxu1 %vm200_vm4, %v791_v47 }
  0x9b   : > { %v197_v48 = vpop.permute.xlu0 %196 }
  0x9c   : > { %vm203_vm5 = vcmp.eq.s32.totalorder %v189_v42, %v197_v48  ;;  %vm205_vm6 = vcmp.eq.s32.totalorder %v191_v43, %v197_v48  ;;  %vm202_vm7 = vcmp.eq.s32.totalorder %v188_v44, %v197_v48  ;;  %vm204_vm8 = vcmp.eq.s32.totalorder %v190_v45, %v197_v48 }
  0x9d   : > { %547 = vmatprep.mubr.msk.f32.mxu0 %vm203_vm5, %v791_v47  ;;  %551 = vmatprep.mubr.msk.f32.mxu1 %vm205_vm6, %v791_v47 }
  0x9e   : > { %548 = vmatmul.mubr.msk.f32.gmra.mrb[2].mxu0 %vm202_vm7, %v791_v47  ;;  %552 = vmatmul.mubr.msk.f32.gmra.mrb[2].mxu1 %vm204_vm8, %v791_v47 }
 0x16d   : > { %v590_v49 = vpop.f32.mrb[0].mxu0  ;;  %v628_v50 = vpop.f32.mrb[0].mxu1 }
 0x16e   : > { %v591_v51 = vpop.f32.mrb[1].mxu0  ;;  %v629_v52 = vpop.f32.mrb[1].mxu1 }
 0x16f   : > { %v592_v53 = vadd.f32 %v591_v51, %v590_v49  ;;  %v630_v54 = vadd.f32 %v629_v52, %v628_v50 }
 0x171   : > { %v430_v56 = vadd.f32 %v630_v54, %v592_v53  ;;  %v593_v57 = vpop.f32.mrb[2].mxu0  ;;  %v631_v58 = vpop.f32.mrb[2].mxu1 }
 0x172   : > { %v594_v59 = vpop.f32.mrb[3].mxu0  ;;  %v632_v60 = vpop.f32.mrb[3].mxu1 }
 0x173   : > { %v438_v61 = vadd.f32 %v430_v56, %v222_v55  ;;  %v595_v62 = vadd.f32 %v594_v59, %v593_v57  ;;  %v633_v63 = vadd.f32 %v632_v60, %v631_v58  ;;  %446 = sbr.rel (%p553_p6) target bundleno = 386 (0x182), region = 36 }
 0x175   : > { %441 = vst.msk [vmem:[#allocation2] sm:$0xff] %vm440_vm9, %v438_v61  ;;  %v435_v1 = vadd.f32 %v633_v63, %v595_v62 }
 0x177   : > { %v439_v2 = vadd.f32 %v435_v1, %v223_v0 }
 0x179   : > { %442 = vst.msk [vmem:[#allocation2 + $0x8] sm:$0xff] %vm440_vm9, %v439_v2 }
 0x17c   : > { %v447_v3 = vld [vmem:[#allocation2] sm:$0xff] }
 0x17d   : > { %449 = vst.msk [vmem:[#allocation3] sm:$0xff] %vm440_vm9, %v447_v3 }
 0x180   : > { %v448_v4 = vld [vmem:[#allocation2 + $0x8] sm:$0xff] }
 0x181   : > { %450 = vst.msk [vmem:[#allocation3 + $0x8] sm:$0xff] %vm440_vm9, %v448_v4 }
 0x182 PF: > { %p916_p7 = scmp.eq.s32.totalorder %s528_s12, 1  ;;  %s792_s25 = smov [#allocation3]  }
 0x183   : > { %s460_s26 = sshll.u32 %s792_s25, 4  ;;  %s461_s26 = int_to_ptr.vmem [resolvable:$true] %s460_s26 }
 0x184   : > { %s735_s27 = scalar_lea.vmem %s461_s26, 256  ;;  %p742_p11 = scmp.lt.s32.totalorder %s461_s26, %s461_s26 }
 0x185   : > { %p736_p8 = scmp.ne.s32.totalorder %s461_s26, %s735_s27  ;;  %p743_p12 = scmp.lt.s32.totalorder %s735_s27, %s735_s27 }
 0x187   : > { %p737_p9 = pnand %p736_p8, %p916_p7  ;;  %p744_p13 = por %p743_p12, %p742_p11 }
 0x189   : > { %p738_p10 = pneg %p737_p9 }
 0x18b   : > { %p745_p0 = pnand %p744_p13, %p738_p10 }
 0x18d   : > { %748 = shalt.err (!%p745_p0)
}
 0x18e   : > { %s749_s30 = scalar_lea.hbm %s953_s2, 256 }
 0x18f   : > { %p750_p1 = scmp.ne.s32.totalorder %s953_s2, %s749_s30  ;;  %p755_p4 = scmp.lt.u32.totalorder %s749_s30, %s953_s2 }
 0x191   : > { %p751_p2 = pnand %p750_p1, %p916_p7 }
 0x193   : > { %p752_p3 = pneg %p751_p2 }
 0x195   : > { %p757_p5 = pnand %p755_p4, %p752_p3 }
 0x197   : > { %760 = shalt.err (!%p757_p5)
}
 0x198   : > { %s793_s7 = smov 128   ;;  %s794_s8 = smov 8  }
 0x199   : > { %699 = dma.vmem_to_hbm [thread:$0]  (%p916_p7), %s461_s26, 256, %s953_s2, [#allocation4], %s793_s7, %s793_s7, %s794_s8  }
 0x19a   : > { %774 = dma.done.wait (%p916_p7), [#allocation4], 256  }
 0x19b   : > { %776 = vsyncadd (%p916_p7), [#allocation4], 4294967040 }
 0x19c PF: > { %s13_s11 = sadd.s32 1, %s787_s11   ;;  %s955_s9 = smov %s783_s10 }
 0x19d   : > { %p10_p6 = scmp.ge.s32.totalorder %s13_s11, 4   ;;  %s956_s10 = smov %s958_s13 }
 0x19f   :  { %12 = sbr.rel (!%p10_p6) target bundleno = 2 (0x2), region = 67 }
 0x1a6   :  { %476 = vsyncpa [#allocation4], 1 }
 0x1a7   :  { %478 = vsyncpa [#allocation4 + $0x1], 1 }

</bundles_post_ra>
